<compile_context>
chip_gen: v7x
topology: tpu7x:2x2x1
jax: 0.10.0
libtpu: 0.0.40
codegen_flags: <defaults>
</compile_context>

<pallas_src>
import jax
import jax.numpy as jnp
from jax.experimental import pallas as pl
from jax.experimental.pallas import tpu as pltpu

LANE = 128


def _pad_lanes(a, target=LANE):
    """Pad the last dim up to (a multiple of) 128 for a lane-dense layout."""
    m = a.shape[-1]
    m_pad = max(target, ((m + target - 1) // target) * target)
    if m_pad == m:
        return a
    pad = [(0, 0)] * (a.ndim - 1) + [(0, m_pad - m)]
    return jnp.pad(a, pad)


# ----------------------------------------------------------------------------
# Kernel: MLP forward for one (trial, batch-tile) grid cell
#   x_ref : [block_b, D]     bf16
#   w*_ref: per-trial weights (trial axis squeezed out via block dim None)
#   o_ref : [block_b, 128]   f32, lane-dense (zero-padded metric columns)
# ----------------------------------------------------------------------------
def mlp_forward_kernel(x_ref, w0_ref, b0_ref, w1_ref, b1_ref, w2_ref, b2_ref,
                       o_ref):
    # projection layer + activation1 (ReLU); bf16 MXU inputs, f32 accumulate.
    h = jnp.dot(x_ref[...], w0_ref[...],
                preferred_element_type=jnp.float32) + b0_ref[...]
    h = jnp.maximum(h, 0.0).astype(w1_ref.dtype)
    # hidden block (num_hid_layers = 1) + ReLU
    h = jnp.dot(h, w1_ref[...],
                preferred_element_type=jnp.float32) + b1_ref[...]
    h = jnp.maximum(h, 0.0).astype(w2_ref.dtype)
    # output head -> lane-dense (128-wide, zero-padded) metric columns
    o_ref[...] = jnp.dot(h, w2_ref[...],
                         preferred_element_type=jnp.float32) + b2_ref[...]


def mlp_forward_trials(x, w0s, b0s, w1s, b1s, w2s, b2s, *, block_b=256):
    """Batched-over-trials MLP forward.

    x   : [B, D]            (shared across trials)
    w0s : [T, D, H]   b0s : [T, 1, H]
    w1s : [T, H, H]   b1s : [T, 1, H]
    w2s : [T, H, 128] b2s : [T, 1, 128]   (head pre-padded to 128 lanes)
    returns [T, B, 128] f32, padded metric columns == 0 (slice at consumption).
    """
    B, D = x.shape
    T, _, H = w0s.shape
    m_pad = w2s.shape[-1]
    # Keep the whole pipeline on aligned (8,128) tiles (see review note).
    assert D % LANE == 0 and H % LANE == 0 and m_pad % LANE == 0, (
        "d_in / projection_layer / padded head must be multiples of 128")

    block_b = min(block_b, B)
    assert B % block_b == 0, "batch must be a multiple of the batch tile"
    nb = B // block_b

    # Grid: (trial, batch-tile).  Batch-tile is the inner (fastest) axis, so a
    # trial's weights stay resident across all of its batch tiles.  Both axes
    # are independent -> "parallel" (v7x megacore sharding; no-op elsewhere).
    grid = (T, nb)

    out = pl.pallas_call(
        mlp_forward_kernel,
        out_shape=jax.ShapeDtypeStruct((T, B, m_pad), jnp.float32),
        grid=grid,
        in_specs=[
            pl.BlockSpec((block_b, D), lambda t, i: (i, 0)),
            pl.BlockSpec((None, D, H), lambda t, i: (t, 0, 0)),
            pl.BlockSpec((None, 1, H), lambda t, i: (t, 0, 0)),
            pl.BlockSpec((None, H, H), lambda t, i: (t, 0, 0)),
            pl.BlockSpec((None, 1, H), lambda t, i: (t, 0, 0)),
            pl.BlockSpec((None, H, m_pad), lambda t, i: (t, 0, 0)),
            pl.BlockSpec((None, 1, m_pad), lambda t, i: (t, 0, 0)),
        ],
        out_specs=pl.BlockSpec((None, block_b, m_pad),
                               lambda t, i: (t, i, 0)),
        compiler_params=pltpu.CompilerParams(
            dimension_semantics=("parallel", "parallel")),
    )(x, w0s, b0s, w1s, b1s, w2s, b2s)
    return out  # padded; real metric columns are [..., :num_metrics]


# ----------------------------------------------------------------------------
# Per-run log accumulation and averaging
#           (train_logs_dict[key] += logs; then /= Nruns)
# Per review: the tensor is <1 KiB, so a pallas_call boundary costs more than
# the compute and blocks fusion -> plain jnp (XLA fuses it with neighbors).
# ----------------------------------------------------------------------------
def average_run_logs(logs):
    """logs: [Nruns, max_epochs, M] float32 -> mean over runs [max_epochs, M]."""
    return jnp.mean(logs, axis=0)


# ----------------------------------------------------------------------------
# Parameter setup (deterministic, in-script).  The head weight/bias are padded
# to 128 lanes HERE (once), not on every forward call.
# ----------------------------------------------------------------------------
def init_trial_params(key, num_trials, d_in, proj, num_metrics):
    keys = jax.random.split(key, 3 * num_trials).reshape(num_trials, 3, 2)
    scale = 0.1
    w0s, b0s, w1s, b1s, w2s, b2s = [], [], [], [], [], []
    for t in range(num_trials):
        k0, k1, k2 = keys[t]
        w0s.append(scale * jax.random.normal(k0, (d_in, proj), jnp.float32))
        b0s.append(jnp.zeros((1, proj), jnp.float32))
        w1s.append(scale * jax.random.normal(k1, (proj, proj), jnp.float32))
        b1s.append(jnp.zeros((1, proj), jnp.float32))
        w2s.append(_pad_lanes(
            scale * jax.random.normal(k2, (proj, num_metrics), jnp.float32)))
        b2s.append(_pad_lanes(jnp.zeros((1, num_metrics), jnp.float32)))
    stack = lambda xs: jnp.stack(xs, axis=0)
    return (stack(w0s), stack(b0s), stack(w1s), stack(b1s),
            stack(w2s), stack(b2s))


if __name__ == "__main__":
    key = jax.random.PRNGKey(0)
    kx, kp, kl = jax.random.split(key, 3)

    # Small, MXU/lane-aligned shapes consistent with the searched model.
    num_trials = 4           # hparam combinations sharing one architecture
    batch = 256              # one 256-row tile per trial (v6e/v7x MXU M dim)
    d_in = 128
    projection_layer = 128   # one model_config.projection_layer trial value
    num_metrics = 4          # config_file.conf.train_params.num_metrics[0]
    num_runs = 3             # train_config.Nruns
    max_epochs = 8           # train_config.max_epochs

    # Shared batch + per-trial stacked parameters (head pre-padded to 128).
    x = jax.random.normal(kx, (batch, d_in), dtype=jnp.float32)
    w0s, b0s, w1s, b1s, w2s, b2s = init_trial_params(
        kp, num_trials, d_in, projection_layer, num_metrics)

    # bf16 operands (f32 MXU accumulation in-kernel): halves VMEM/HBM traffic
    # and doubles MXU throughput on v6e/v7x; biases/ReLU stay f32 (no bf16
    # VPU on v5e).
    x_bf = x.astype(jnp.bfloat16)
    w0s_bf = w0s.astype(jnp.bfloat16)
    w1s_bf = w1s.astype(jnp.bfloat16)
    w2s_bf = w2s.astype(jnp.bfloat16)

    # One kernel launch for ALL trials' forward passes.
    y = mlp_forward_trials(x_bf, w0s_bf, b0s, w1s_bf, b1s, w2s_bf, b2s,
                           block_b=256)
    y = jax.block_until_ready(y)   # [T, B, 128], padded cols are exact zeros

    # Reference check (same bf16 operands, f32 accumulation), vmapped over T.
    def ref_forward(xb, w0, b0, w1, b1, w2p, b2p):
        h = jnp.maximum(
            jnp.dot(xb, w0, preferred_element_type=jnp.float32) + b0, 0.0)
        h = jnp.maximum(
            jnp.dot(h.astype(jnp.bfloat16), w1,
                    preferred_element_type=jnp.float32) + b1, 0.0)
        return jnp.dot(h.astype(jnp.bfloat16), w2p,
                       preferred_element_type=jnp.float32) + b2p

    y_ref = jax.vmap(ref_forward, in_axes=(None, 0, 0, 0, 0, 0, 0))(
        x_bf, w0s_bf, b0s, w1s_bf, b1s, w2s_bf, b2s)
    assert jnp.allclose(y, y_ref, atol=1e-2, rtol=1e-2), "MLP kernel mismatch"
    # Real metric columns are consumed lazily; padded columns must be zero.
    assert jnp.all(y[..., num_metrics:] == 0.0), "padding columns not zero"

    # Run-log accumulation/averaging (train_logs_dict[key] += ...; /= Nruns)
    train_logs = jax.random.normal(
        kl, (num_runs, max_epochs, num_metrics + 3), dtype=jnp.float32)
    logs_mean = jax.block_until_ready(average_run_logs(train_logs))
    assert jnp.allclose(logs_mean, jnp.mean(train_logs, axis=0),
                        atol=1e-5), "log-averaging mismatch"

    print("KERNEL_OK")
</pallas_src>

<mosaic_0001>
module attributes {stable_mosaic.version = 11 : i64} {
  func.func @mlp_forward_kernel(%arg0: i32, %arg1: i32, %arg2: memref<256x128xbf16, #tpu.memory_space<vmem>>, %arg3: memref<1x128x128xbf16, #tpu.memory_space<vmem>>, %arg4: memref<1x1x128xf32, #tpu.memory_space<vmem>>, %arg5: memref<1x128x128xbf16, #tpu.memory_space<vmem>>, %arg6: memref<1x1x128xf32, #tpu.memory_space<vmem>>, %arg7: memref<1x128x128xbf16, #tpu.memory_space<vmem>>, %arg8: memref<1x1x128xf32, #tpu.memory_space<vmem>>, %arg9: memref<1x256x128xf32, #tpu.memory_space<vmem>>) attributes {dimension_semantics = [#tpu.dimension_semantics<parallel>, #tpu.dimension_semantics<parallel>], iteration_bounds = array<i64: 4, 1>, scalar_prefetch = 0 : i64, scratch_operands = 0 : i64, tpu.core_type = #tpu.core_type<tc>, window_params = [{transform_indices = @transform_0, window_bounds = array<i64: 256, 128>}, {transform_indices = @transform_1, window_bounds = array<i64: 1, 128, 128>}, {transform_indices = @transform_2, window_bounds = array<i64: 1, 1, 128>}, {transform_indices = @transform_3, window_bounds = array<i64: 1, 128, 128>}, {transform_indices = @transform_4, window_bounds = array<i64: 1, 1, 128>}, {transform_indices = @transform_5, window_bounds = array<i64: 1, 128, 128>}, {transform_indices = @transform_6, window_bounds = array<i64: 1, 1, 128>}, {transform_indices = @transform_7, window_bounds = array<i64: 1, 256, 128>}]} {
    %c0 = arith.constant 0 : index
    %c0_0 = arith.constant 0 : index
    %0 = vector.load %arg2[%c0, %c0_0] : memref<256x128xbf16, #tpu.memory_space<vmem>>, vector<256x128xbf16>
    %c0_1 = arith.constant 0 : index
    %c0_2 = arith.constant 0 : index
    %c0_3 = arith.constant 0 : index
    %1 = vector.load %arg3[%c0_1, %c0_2, %c0_3] : memref<1x128x128xbf16, #tpu.memory_space<vmem>>, vector<1x128x128xbf16>
    %2 = vector.shape_cast %1 : vector<1x128x128xbf16> to vector<128x128xbf16>
    %cst = arith.constant dense<0.000000e+00> : vector<256x128xf32>
    %3 = tpu.matmul %0, %2, %cst {dimension_numbers = #tpu.dot_dimension_numbers<[1], [0], [0], [1], [0, 0, 1, 1], [], []>} : vector<256x128xbf16>, vector<128x128xbf16>, vector<256x128xf32> -> vector<256x128xf32>
    %c0_4 = arith.constant 0 : index
    %c0_5 = arith.constant 0 : index
    %c0_6 = arith.constant 0 : index
    %4 = vector.load %arg4[%c0_4, %c0_5, %c0_6] : memref<1x1x128xf32, #tpu.memory_space<vmem>>, vector<1x1x128xf32>
    %5 = vector.shape_cast %4 : vector<1x1x128xf32> to vector<1x128xf32>
    %6 = vector.broadcast %5 : vector<1x128xf32> to vector<256x128xf32>
    %7 = arith.addf %3, %6 : vector<256x128xf32>
    %cst_7 = arith.constant 0.000000e+00 : f32
    %8 = vector.broadcast %cst_7 : f32 to vector<256x128xf32>
    %9 = arith.maximumf %7, %8 : vector<256x128xf32>
    %10 = arith.truncf %9 : vector<256x128xf32> to vector<256x128xbf16>
    %c0_8 = arith.constant 0 : index
    %c0_9 = arith.constant 0 : index
    %c0_10 = arith.constant 0 : index
    %11 = vector.load %arg5[%c0_8, %c0_9, %c0_10] : memref<1x128x128xbf16, #tpu.memory_space<vmem>>, vector<1x128x128xbf16>
    %12 = vector.shape_cast %11 : vector<1x128x128xbf16> to vector<128x128xbf16>
    %cst_11 = arith.constant dense<0.000000e+00> : vector<256x128xf32>
    %13 = tpu.matmul %10, %12, %cst_11 {dimension_numbers = #tpu.dot_dimension_numbers<[1], [0], [0], [1], [0, 0, 1, 1], [], []>} : vector<256x128xbf16>, vector<128x128xbf16>, vector<256x128xf32> -> vector<256x128xf32>
    %c0_12 = arith.constant 0 : index
    %c0_13 = arith.constant 0 : index
    %c0_14 = arith.constant 0 : index
    %14 = vector.load %arg6[%c0_12, %c0_13, %c0_14] : memref<1x1x128xf32, #tpu.memory_space<vmem>>, vector<1x1x128xf32>
    %15 = vector.shape_cast %14 : vector<1x1x128xf32> to vector<1x128xf32>
    %16 = vector.broadcast %15 : vector<1x128xf32> to vector<256x128xf32>
    %17 = arith.addf %13, %16 : vector<256x128xf32>
    %cst_15 = arith.constant 0.000000e+00 : f32
    %18 = vector.broadcast %cst_15 : f32 to vector<256x128xf32>
    %19 = arith.maximumf %17, %18 : vector<256x128xf32>
    %20 = arith.truncf %19 : vector<256x128xf32> to vector<256x128xbf16>
    %c0_16 = arith.constant 0 : index
    %c0_17 = arith.constant 0 : index
    %c0_18 = arith.constant 0 : index
    %21 = vector.load %arg7[%c0_16, %c0_17, %c0_18] : memref<1x128x128xbf16, #tpu.memory_space<vmem>>, vector<1x128x128xbf16>
    %22 = vector.shape_cast %21 : vector<1x128x128xbf16> to vector<128x128xbf16>
    %cst_19 = arith.constant dense<0.000000e+00> : vector<256x128xf32>
    %23 = tpu.matmul %20, %22, %cst_19 {dimension_numbers = #tpu.dot_dimension_numbers<[1], [0], [0], [1], [0, 0, 1, 1], [], []>} : vector<256x128xbf16>, vector<128x128xbf16>, vector<256x128xf32> -> vector<256x128xf32>
    %c0_20 = arith.constant 0 : index
    %c0_21 = arith.constant 0 : index
    %c0_22 = arith.constant 0 : index
    %24 = vector.load %arg8[%c0_20, %c0_21, %c0_22] : memref<1x1x128xf32, #tpu.memory_space<vmem>>, vector<1x1x128xf32>
    %25 = vector.shape_cast %24 : vector<1x1x128xf32> to vector<1x128xf32>
    %26 = vector.broadcast %25 : vector<1x128xf32> to vector<256x128xf32>
    %27 = arith.addf %23, %26 : vector<256x128xf32>
    %c0_23 = arith.constant 0 : index
    %c0_24 = arith.constant 0 : index
    %c0_25 = arith.constant 0 : index
    %28 = vector.load %arg9[%c0_23, %c0_24, %c0_25] : memref<1x256x128xf32, #tpu.memory_space<vmem>>, vector<1x256x128xf32>
    %29 = vector.shape_cast %28 : vector<1x256x128xf32> to vector<256x128xf32>
    %30 = vector.shape_cast %27 : vector<256x128xf32> to vector<1x256x128xf32>
    tpu.vector_store %arg9[%c0_23, %c0_24, %c0_25], %30 {strides = array<i32>} : memref<1x256x128xf32, #tpu.memory_space<vmem>>, vector<1x256x128xf32>,
    return
  }
  func.func @transform_0(%arg0: i32, %arg1: i32) -> (i32, i32) {
    %c0_i32 = arith.constant 0 : i32
    %c0_i32_0 = arith.constant 0 : i32
    return %arg1, %c0_i32 : i32, i32
  }
  func.func @transform_1(%arg0: i32, %arg1: i32) -> (i32, i32, i32) {
    %c0_i32 = arith.constant 0 : i32
    %c0_i32_0 = arith.constant 0 : i32
    %c0_i32_1 = arith.constant 0 : i32
    return %arg0, %c0_i32, %c0_i32_0 : i32, i32, i32
  }
  func.func @transform_2(%arg0: i32, %arg1: i32) -> (i32, i32, i32) {
    %c0_i32 = arith.constant 0 : i32
    %c0_i32_0 = arith.constant 0 : i32
    %c0_i32_1 = arith.constant 0 : i32
    return %arg0, %c0_i32, %c0_i32_0 : i32, i32, i32
  }
  func.func @transform_3(%arg0: i32, %arg1: i32) -> (i32, i32, i32) {
    %c0_i32 = arith.constant 0 : i32
    %c0_i32_0 = arith.constant 0 : i32
    %c0_i32_1 = arith.constant 0 : i32
    return %arg0, %c0_i32, %c0_i32_0 : i32, i32, i32
  }
  func.func @transform_4(%arg0: i32, %arg1: i32) -> (i32, i32, i32) {
    %c0_i32 = arith.constant 0 : i32
    %c0_i32_0 = arith.constant 0 : i32
    %c0_i32_1 = arith.constant 0 : i32
    return %arg0, %c0_i32, %c0_i32_0 : i32, i32, i32
  }
  func.func @transform_5(%arg0: i32, %arg1: i32) -> (i32, i32, i32) {
    %c0_i32 = arith.constant 0 : i32
    %c0_i32_0 = arith.constant 0 : i32
    %c0_i32_1 = arith.constant 0 : i32
    return %arg0, %c0_i32, %c0_i32_0 : i32, i32, i32
  }
  func.func @transform_6(%arg0: i32, %arg1: i32) -> (i32, i32, i32) {
    %c0_i32 = arith.constant 0 : i32
    %c0_i32_0 = arith.constant 0 : i32
    %c0_i32_1 = arith.constant 0 : i32
    return %arg0, %c0_i32, %c0_i32_0 : i32, i32, i32
  }
  func.func @transform_7(%arg0: i32, %arg1: i32) -> (i32, i32, i32) {
    %c0_i32 = arith.constant 0 : i32
    %c0_i32_0 = arith.constant 0 : i32
    return %arg0, %arg1, %c0_i32 : i32, i32, i32
  }
}

</mosaic_0001>

<bundles_post_ra>
// kernel: tpu_custom_call.1
= control target key start
LH: loop header
LB: loop body
LE: loop exit
PB: predicated region body
PF: predicated region fallthrough
CT: control target
= control target key end

     0   :  { %s2796_s0 = inlined_call_operand.hbm [shape: bf16[256,128], index: 0, kind: input, shape index: {}]   ;;  %s2797_s1 = inlined_call_operand.hbm [shape: bf16[4,128,128], index: 1, kind: input, shape index: {}]   ;;  %s2798_s2 = inlined_call_operand.vmem [shape: f32[4,1,128], index: 2, kind: input, shape index: {}]   ;;  %s2799_s3 = inlined_call_operand.hbm [shape: bf16[4,128,128], index: 3, kind: input, shape index: {}]   ;;  %s2800_s4 = inlined_call_operand.vmem [shape: f32[4,1,128], index: 4, kind: input, shape index: {}]   ;;  %s2801_s5 = inlined_call_operand.hbm [shape: bf16[4,128,128], index: 5, kind: input, shape index: {}]   ;;  %s2802_s6 = inlined_call_operand.vmem [shape: f32[4,1,128], index: 6, kind: input, shape index: {}]   ;;  %s2803_s7 = inlined_call_operand.hbm [shape: f32[4,256,128], index: 7, kind: output, shape index: {}]  }
   0x1   :  { %2824 = sst [smem:[#allocation21_spill]] %s2797_s1 }
   0x2   :  { %2825 = sst [smem:[#allocation22_spill]] %s2799_s3 }
   0x3   :  { %12 = vsyncpa [#allocation3], 0 }
   0x4   :  { %13 = vsyncpa [#allocation6], 0 }
   0x5   :  { %15 = vsyncpa [#allocation6 + $0x1], 0 }
   0x6   :  { %16 = vsyncpa [#allocation9], 0 }
   0x7   :  { %18 = vsyncpa [#allocation9 + $0x1], 0 }
   0x8   :  { %19 = vsyncpa [#allocation4], 0 }
   0x9   :  { %21 = vsyncpa [#allocation4 + $0x1], 0  ;;  %s2282_s24 = smov 0   ;;  %s2284_s25 = smov 0  }
   0xa   :  { %s2286_s26 = smov 0   ;;  %s2288_s27 = smov 0  }
   0xb   :  { %s2290_s28 = smov 0   ;;  %s2292_s29 = smov 0  }
   0xc LB: > { %2826 = sst [smem:[#allocation15_spill]] %s2211_s24  ;;  %s39_s30 = sadd.s32 1, %s2227_s28  ;;  %s2231_s29 = sphi %s2292_s29, %s27_s29   ;;  %s2227_s28 = sphi %s2290_s28, %s2860_s28   ;;  %s2223_s27 = sphi %s2288_s27, %s2859_s27   ;;  %s2219_s26 = sphi %s2286_s26, %s2863_s26   ;;  %s2215_s25 = sphi %s2284_s25, %s2862_s25   ;;  %s2211_s24 = sphi %s2282_s24, %s2861_s24  }
   0xd   : > { %2827 = sst [smem:[#allocation16_spill]] %s2227_s28  ;;  %s72_s8 = sadd.s32 1, %s2219_s26 }
   0xe   : > { %2828 = sst [smem:[#allocation17_spill]] %s2231_s29  ;;  %p41_p0 = scmp.ge.s32.totalorder %s39_s30, 4 }
   0xf   : > { %p2804_p1 = scmp.ne.s32.totalorder %s2219_s26, %s2215_s25  ;;  %p80_p2 = scmp.eq.s32.totalorder %s2231_s29, 0 }
  0x10   : > { %s2865_s30 = smov (%p41_p0, %s39_s30), 0  ;;  %p1927_p5 = scmp.lt.s32.totalorder %s2231_s29, 4 }
  0x11   : > { %2829 = sst [smem:[#allocation18_spill]] %s2865_s30  ;;  %p2322_p3 = por %p80_p2, %p2804_p1 }
  0x12   : > { %s69_s10 = ssub.s32 %s2227_s28, %s2865_s30  ;;  %s283_s11 = sand.u32 1, %s2231_s29  }
  0x13   : > { %p70_p4 = scmp.eq.s32.totalorder %s69_s10, 0  ;;  %s2805_s12 = sand.u32 1, %s2219_s26  }
  0x14   : > { %s2336_s14 = sshll.u32 %s2805_s12, 6  ;;  %s2339_s15 = sshll.u32 %s2227_s28, 10 }
  0x15   : > { %s2332_s13 = scalar_select %p70_p4, %s2219_s26, %s72_s8  }
  0x16   : > { %s2832_s1 = sld [smem:[#allocation21_spill]]  ;;  %s287_s19 = scalar_lea.vmem [#allocation5], %s2336_s14 }
  0x17   : > { %2831 = sst [smem:[#allocation19_spill]] %s2332_s13  ;;  %s294_s20 = sshll.u32 %s287_s19, 4  ;;  %s2348_s20 = int_to_ptr.vmem [resolvable:$true] %s294_s20 }
  0x18   : > { %p2352_p6 = pnand %p1927_p5, %p2322_p3  ;;  %s2356_s22 = scalar_lea.sflag [#allocation6], %s283_s11 }
  0x1a   : > { %s2833_s21 = scalar_select %p2352_p6, 1, 0 }
  0x1b   : > { %p2362_p8 = pneg %p2352_p6 }
  0x1c   : > { %s2345_s18 = scalar_lea.hbm %s2832_s1, %s2339_s15  ;;  %s2028_s16 = scalar_lea.hbm %s2832_s1, 4096 }
  0x1d   : > { %s2023_s23 = scalar_lea.hbm %s2345_s18, 1024  ;;  %p2029_p11 = scmp.lt.u32.totalorder %s2345_s18, %s2832_s1 }
  0x1e   : > { %p2024_p7 = scmp.ne.s32.totalorder %s2345_s18, %s2023_s23  ;;  %p2030_p12 = scmp.lt.u32.totalorder %s2028_s16, %s2023_s23 }
  0x1f   : > { %s2834_s8 = scalar_select %p2362_p8, 1, 0 }
  0x20   : > { %p2026_p9 = pnand %p2362_p8, %p2024_p7  ;;  %p2031_p13 = por %p2030_p12, %p2029_p11 }
  0x21   : > { %p2032_p0 = scmp.lt.u32.totalorder %s2023_s23, %s2345_s18 }
  0x22   : > { %p2027_p10 = pneg %p2026_p9 }
  0x23   : > { %p2033_p2 = por %p2032_p0, %p2031_p13 }
  0x25   : > { %p2034_p3 = pnand %p2033_p2, %p2027_p10 }
  0x27   : > { %2037 = shalt.err (!%p2034_p3)
}
  0x28   : > { %s2038_s11 = scalar_lea.vmem %s2348_s20, 1024  ;;  %s2233_s10 = smov [#allocation5]  }
  0x29   : > { %p2039_p4 = scmp.ne.s32.totalorder %s2348_s20, %s2038_s11  ;;  %s2043_s9 = sshll.u32 %s2233_s10, 4  ;;  %s2044_s9 = int_to_ptr.vmem [resolvable:$false] %s2043_s9 }
  0x2a   : > { %s2045_s17 = scalar_lea.vmem %s2044_s9, 2048  ;;  %p2046_p9 = scmp.lt.s32.totalorder %s2348_s20, %s2044_s9 }
  0x2b   : > { %p2041_p5 = pnand %p2039_p4, %p2362_p8  ;;  %p2047_p1 = scmp.lt.s32.totalorder %s2045_s17, %s2038_s11 }
  0x2d   : > { %p2042_p7 = pneg %p2041_p5  ;;  %p2048_p11 = por %p2047_p1, %p2046_p9 }
  0x2f   : > { %p2049_p12 = pnand %p2048_p11, %p2042_p7 }
  0x31   : > { %2052 = shalt.err (!%p2049_p12)
}
  0x32   : > { %s2806_s23 = smov 64   ;;  %s2808_s16 = smov 4  }
  0x33   : > { %1915 = dma.hbm_to_vmem [thread:$0]  (!%p2352_p6), %s2345_s18, 1024, %s2348_s20, %s2356_s22, %s2806_s23, %s2806_s23, %s2808_s16  }
  0x34   : > { %s2390_s19 = sadd.s32 4294967295, %s2231_s29   ;;  %s1593_s11 = sadd.s32 4294967294, %s2231_s29  }
  0x35   : > { %p85_p1 = scmp.ne.s32.totalorder %s2215_s25, %s2211_s24  ;;  %p2814_p10 = scmp.eq.s32.totalorder %s2390_s19, 0 }
  0x36   : > { %p241_p13 = scmp.eq.s32.totalorder %s2390_s19, 3  ;;  %p247_p0 = scmp.eq.s32.totalorder %s1593_s11, 3 }
  0x37   : > { %p1594_p2 = scmp.ge.s32.totalorder %s2231_s29, 1  ;;  %p2400_p3 = por %p2814_p10, %p85_p1 }
  0x38   : > { %p2836_p4 = scmp.ne.s32.totalorder %s2219_s26, %s2215_s25  ;;  %p2411_p7 = por %p247_p0, %p85_p1 }
  0x39   : > { %s2835_s10 = scalar_select %p2400_p3, 1, 0 }
  0x3a   : > { %p2407_p5 = por %p241_p13, %p2836_p4  ;;  %p254_p9 = scmp.lt.s32.totalorder %s2231_s29, 5 }
  0x3b   : > { %s2838_s20 = scalar_select %p2411_p7, 1, 0 }
  0x3c   : > { %s2837_s18 = scalar_select %p2407_p5, 1, 0 }
  0x3d   : > { %2839 = sst [smem:[#allocation20_spill]] %s2838_s20  ;;  %p2416_p11 = pnand %p1594_p2, %p254_p9 }
  0x3e   : > { %s2236_s17 = smov [#allocation2]   ;;  %s2841_s3 = sld [smem:[#allocation22_spill]] }
  0x3f   : > { %s2840_s9 = scalar_select %p2416_p11, 1, 0 }
  0x40   : > { %s269_s11 = sshll.u32 %s2236_s17, 4  ;;  %p1908_p12 = pneg %p2416_p11  ;;  %s2420_s11 = int_to_ptr.vmem [resolvable:$true] %s269_s11 }
  0x41   : > { %s314_s1 = scalar_lea.vmem [#allocation7], %s2336_s14 }
  0x42   : > { %s321_s30 = sshll.u32 %s314_s1, 4  ;;  %p2433_p1 = pnand %p1908_p12, %p2814_p10  ;;  %s2437_s30 = int_to_ptr.vmem [resolvable:$true] %s321_s30 }
  0x44   : > { %s2428_s16 = scalar_lea.hbm %s2841_s3, %s2339_s15  ;;  %s2058_s13 = scalar_lea.hbm %s2841_s3, 4096 }
  0x45   : > { %s2842_s28 = scalar_select %p2433_p1, 1, 0 }
  0x46   : > { %s2053_s17 = scalar_lea.hbm %s2428_s16, 1024  ;;  %p2059_p4 = scmp.lt.u32.totalorder %s2428_s16, %s2841_s3 }
  0x47   : > { %p2054_p13 = scmp.ne.s32.totalorder %s2428_s16, %s2053_s17  ;;  %p2060_p9 = scmp.lt.u32.totalorder %s2058_s13, %s2053_s17 }
  0x48   : > { %p2062_p10 = scmp.lt.u32.totalorder %s2053_s17, %s2428_s16 }
  0x49   : > { %p2056_p0 = pnand %p2054_p13, %p2362_p8  ;;  %p2061_p12 = por %p2060_p9, %p2059_p4 }
  0x4b   : > { %p2057_p2 = pneg %p2056_p0  ;;  %p2063_p7 = por %p2062_p10, %p2061_p12 }
  0x4d   : > { %p2064_p5 = pnand %p2063_p7, %p2057_p2 }
  0x4f   : > { %2067 = shalt.err (!%p2064_p5)
}
  0x50   : > { %s2068_s1 = scalar_lea.vmem %s2437_s30, 1024  ;;  %s2237_s12 = smov [#allocation7]  }
  0x51   : > { %p2069_p13 = scmp.ne.s32.totalorder %s2437_s30, %s2068_s1  ;;  %s2073_s23 = sshll.u32 %s2237_s12, 4  ;;  %s2074_s23 = int_to_ptr.vmem [resolvable:$false] %s2073_s23 }
  0x52   : > { %s2075_s24 = scalar_lea.vmem %s2074_s23, 2048  ;;  %p2076_p11 = scmp.lt.s32.totalorder %s2437_s30, %s2074_s23 }
  0x53   : > { %p2071_p0 = pnand %p2069_p13, %p2362_p8  ;;  %p2077_p1 = scmp.lt.s32.totalorder %s2075_s24, %s2068_s1 }
  0x55   : > { %p2072_p3 = pneg %p2071_p0  ;;  %p2078_p4 = por %p2077_p1, %p2076_p11 }
  0x57   : > { %p2079_p9 = pnand %p2078_p4, %p2072_p3 }
  0x59   : > { %2082 = shalt.err (!%p2079_p9)
}
  0x5a   : > { %s2843_s13 = smov 4   ;;  %s2844_s20 = smov 64  }
  0x5b   : > { %1918 = dma.hbm_to_vmem [thread:$0]  (!%p2352_p6), %s2428_s16, 1024, %s2437_s30, %s2356_s22, %s2844_s20, %s2844_s20, %s2843_s13  }
  0x5c   : > { %s2083_s12 = scalar_lea.hbm %s2796_s0, 2048  ;;  %p2845_p3 = scmp.ne.s32.totalorder %s2842_s28, 0 }
  0x5d   : > { %p2084_p10 = scmp.ne.s32.totalorder %s2796_s0, %s2083_s12  ;;  %p2090_p1 = scmp.lt.u32.totalorder %s2083_s12, %s2796_s0 }
  0x5e   : > { %p2085_p5 = pneg %p2845_p3 }
  0x60   : > { %p2086_p7 = pnand %p2085_p5, %p2084_p10 }
  0x62   : > { %p2087_p11 = pneg %p2086_p7 }
  0x64   : > { %p2092_p2 = pnand %p2090_p1, %p2087_p11 }
  0x66   : > { %2095 = shalt.err (!%p2092_p2)
}
  0x67   : > { %s2096_s30 = scalar_lea.vmem %s2420_s11, 2048  ;;  %p2104_p4 = scmp.lt.s32.totalorder %s2420_s11, %s2420_s11 }
  0x68   : > { %p2097_p12 = scmp.ne.s32.totalorder %s2420_s11, %s2096_s30  ;;  %p2105_p9 = scmp.lt.s32.totalorder %s2096_s30, %s2096_s30 }
  0x6a   : > { %p2099_p13 = pnand %p2097_p12, %p2085_p5  ;;  %p2106_p6 = por %p2105_p9, %p2104_p4 }
  0x6c   : > { %p2100_p0 = pneg %p2099_p13 }
  0x6e   : > { %p2107_p8 = pnand %p2106_p6, %p2100_p0 }
  0x70   : > { %2110 = shalt.err (!%p2107_p8)
}
  0x71   : > { %1911 = dma.hbm_to_vmem [thread:$0]  (!%p2845_p3), %s2796_s0, 2048, %s2420_s11, [#allocation3], %s2844_s20, %s2844_s20, %s2843_s13  }
  0x72   : > { %s2492_s17 = scalar_lea.hbm %s2801_s5, %s2339_s15  ;;  %s341_s28 = scalar_lea.vmem [#allocation8], %s2336_s14 }
  0x73   : > { %s348_s12 = sshll.u32 %s341_s28, 4  ;;  %s2846_s23 = sand.u32 1, %s2219_s26   ;;  %s2495_s12 = int_to_ptr.vmem [resolvable:$true] %s348_s12 }
  0x74   : > { %s2499_s1 = scalar_lea.sflag [#allocation9], %s2846_s23  ;;  %s2111_s24 = scalar_lea.hbm %s2492_s17, 1024 }
  0x75   : > { %p2112_p6 = scmp.ne.s32.totalorder %s2492_s17, %s2111_s24  ;;  %p2847_p8 = scmp.ne.s32.totalorder %s2834_s8, 0 }
  0x76   : > { %s2116_s15 = scalar_lea.hbm %s2801_s5, 4096  ;;  %p2117_p5 = scmp.lt.u32.totalorder %s2492_s17, %s2801_s5 }
  0x77   : > { %p2114_p10 = pnand %p2112_p6, %p2847_p8  ;;  %p2118_p7 = scmp.lt.u32.totalorder %s2116_s15, %s2111_s24 }
  0x78   : > { %p2120_p1 = scmp.lt.u32.totalorder %s2111_s24, %s2492_s17 }
  0x79   : > { %p2115_p3 = pneg %p2114_p10  ;;  %p2119_p11 = por %p2118_p7, %p2117_p5 }
  0x7b   : > { %p2121_p2 = por %p2120_p1, %p2119_p11 }
  0x7d   : > { %p2122_p12 = pnand %p2121_p2, %p2115_p3 }
  0x7f   : > { %2125 = shalt.err (!%p2122_p12)
}
  0x80   : > { %s2126_s14 = scalar_lea.vmem %s2495_s12, 1024  ;;  %s2238_s22 = smov [#allocation8]  }
  0x81   : > { %p2127_p13 = scmp.ne.s32.totalorder %s2495_s12, %s2126_s14  ;;  %s2131_s16 = sshll.u32 %s2238_s22, 4  ;;  %s2132_s16 = int_to_ptr.vmem [resolvable:$false] %s2131_s16 }
  0x82   : > { %s2133_s28 = scalar_lea.vmem %s2132_s16, 2048  ;;  %p2134_p9 = scmp.lt.s32.totalorder %s2495_s12, %s2132_s16 }
  0x83   : > { %p2129_p0 = pnand %p2127_p13, %p2847_p8  ;;  %p2135_p6 = scmp.lt.s32.totalorder %s2133_s28, %s2126_s14 }
  0x85   : > { %p2130_p4 = pneg %p2129_p0  ;;  %p2136_p10 = por %p2135_p6, %p2134_p9 }
  0x87   : > { %p2137_p5 = pnand %p2136_p10, %p2130_p4 }
  0x89   : > { %2140 = shalt.err (!%p2137_p5)
}
  0x8a   : > { %p2848_p3 = scmp.ne.s32.totalorder %s2833_s21, 0  ;;  %p2849_p8 = scmp.ne.s32.totalorder %s2840_s9, 0 }
  0x8b   : > { %p2850_p7 = scmp.eq.s32.totalorder (!%p2849_p8), %s2390_s19, 0 }
  0x8c   : > { %1921 = dma.hbm_to_vmem [thread:$0]  (!%p2848_p3), %s2492_s17, 1024, %s2495_s12, %s2499_s1, %s2844_s20, %s2844_s20, %s2843_s13  }
  0x8d   : > { %366 = sbr.rel (%p2849_p8) target bundleno = 922 (0x39a), region = 48 }
  0x94   : > { %2194 = dma.done.wait (%p2850_p7), [#allocation3], 2048   ;;  %p2851_p11 = pmov %p2850_p7 }
  0x95   : > { %s372_s21 = sand.u32 1, %s2390_s19   ;;  %s2534_s8 = sand.u32 1, %s2215_s25  }
  0x96   : > { %2196 = vsyncadd (%p2851_p11), [#allocation3], 4294965248  ;;  %s1608_s23 = sshll.u32 %s2534_s8, 6  ;;  %s373_s24 = scalar_lea.sflag [#allocation6], %s372_s21 }
  0x97   : > { %s2537_s11 = scalar_lea.vmem [#allocation5], %s1608_s23  ;;  %p2852_p1 = scmp.ne.s32.totalorder %s2835_s10, 0 }
  0x99   : > { %2198 = dma.done.wait (%p2852_p1), %s373_s24, 2048  }
  0x9a   : > { %2200 = vsyncadd (%p2852_p1), %s373_s24, 4294965248  ;;  %s2543_s9 = scalar_lea.vmem [#allocation7], %s1608_s23  ;;  %s391_s13 = scalar_lea.sflag [#allocation9], %s2534_s8 }
  0x9b   : > { %s2546_s20 = scalar_lea.vmem [#allocation8], %s1608_s23 }
  0x9c   : > { %2202 = dma.done.wait (%p2852_p1), %s391_s13, 1024  }
  0x9d   : > { %2204 = vsyncadd (%p2852_p1), %s391_s13, 4294966272  ;;  %v1983_v0 = vld [vmem:[%s2537_s11] sm:$0xff]   ;;  %v1984_v1 = vld [vmem:[%s2537_s11 + $0x8] sm:$0xff]   ;;  %p445_p2 = scmp.lt.s32.totalorder %s2223_s27, 3  ;;  %s1611_s22 = sshll.u32 %s2534_s8, 8 }
  0x9e   : > { %1736 = vmatprep.subr.bf16.mxu0 %v1983_v0  ;;  %1880 = vmatprep.subr.bf16.mxu1 %v1983_v0  ;;  %v1985_v2 = vld [vmem:[%s2537_s11 + $0x10] sm:$0xff]   ;;  %v1986_v3 = vld [vmem:[%s2537_s11 + $0x18] sm:$0xff]   ;;  %v1991_v4 = vld [vmem:[#allocation2] sm:$0xff]   ;;  %s2677_s16 = scalar_lea.vmem [#allocation10], %s1611_s22  ;;  %s1663_s28 = sshll.u32 %s2223_s27, 12 }
  0x9f   : > { %1737 = vmatpush3.bf16.msra.mxu0 %v1983_v0  ;;  %1888 = vmatpush3.bf16.msra.mxu1 %v1983_v0  ;;  %v1987_v5 = vld [vmem:[%s2537_s11 + $0x20] sm:$0xff]   ;;  %v1988_v6 = vld [vmem:[%s2537_s11 + $0x28] sm:$0xff]   ;;  %v1989_v8 = vld [vmem:[%s2537_s11 + $0x30] sm:$0xff]   ;;  %s2576_s19 = scalar_select %p445_p2, %s2223_s27, 3 }
  0xa0   : > { %1738 = vmatprep.subr.bf16.mxu0 %v1984_v1  ;;  %1881 = vmatprep.subr.bf16.mxu1 %v1984_v1  ;;  %v1999_v7 = vld [vmem:[#allocation2 + $0x40] sm:$0xff]   ;;  %v1990_v9 = vld [vmem:[%s2537_s11 + $0x38] sm:$0xff]   ;;  %v1992_v10 = vld [vmem:[#allocation2 + $0x8] sm:$0xff]   ;;  %s1424_s21 = sshll.u32 %s2677_s16, 4  ;;  %s2742_s11 = scalar_lea.hbm %s2803_s7, %s1663_s28  ;;  %s2744_s21 = int_to_ptr.vmem [resolvable:$true] %s1424_s21 }
  0xa1   : > { %1752 = vmatprep.mubr.bf16.mxu0 %v1991_v4  ;;  %1768 = vmatprep.mubr.bf16.mxu1 %v1999_v7  ;;  %v2000_v11 = vld [vmem:[#allocation2 + $0x48] sm:$0xff]   ;;  %v2007_v12 = vld [vmem:[%s2543_s9] sm:$0xff]   ;;  %v1993_v13 = vld [vmem:[#allocation2 + $0x10] sm:$0xff]   ;;  %s447_s12 = scalar_lea.vmem %s2798_s2, %s2576_s19  ;;  %s450_s15 = scalar_lea.vmem %s2800_s4, %s2576_s19 }
  0xa2   : > { %v2001_v14 = vld [vmem:[#allocation2 + $0x50] sm:$0xff]   ;;  %v2008_v15 = vld [vmem:[%s2543_s9 + $0x8] sm:$0xff]   ;;  %v1994_v17 = vld [vmem:[#allocation2 + $0x18] sm:$0xff]   ;;  %s453_s14 = scalar_lea.vmem %s2802_s6, %s2576_s19  ;;  %s1409_s27 = scalar_lea.sflag [#allocation4], %s2534_s8 }
  0xa3   : > { %1739 = vmatpush3.bf16.msra.mxu0 %v1984_v1  ;;  %1889 = vmatpush3.bf16.msra.mxu1 %v1984_v1  ;;  %v2009_v16 = vld [vmem:[%s2543_s9 + $0x10] sm:$0xff]   ;;  %v2002_v18 = vld [vmem:[#allocation2 + $0x58] sm:$0xff]   ;;  %v1995_v19 = vld [vmem:[#allocation2 + $0x20] sm:$0xff]   ;;  %p2853_p13 = scmp.ne.s32.totalorder %s2837_s18, 0  ;;  %s2239_s13 = smov [#allocation10]  }
  0xa4   : > { %1740 = vmatprep.subr.bf16.mxu0 %v1985_v2  ;;  %1882 = vmatprep.subr.bf16.mxu1 %v1985_v2  ;;  %v2003_v20 = vld [vmem:[#allocation2 + $0x60] sm:$0xff]   ;;  %v2010_v21 = vld [vmem:[%s2543_s9 + $0x18] sm:$0xff]   ;;  %v1996_v23 = vld [vmem:[#allocation2 + $0x28] sm:$0xff]  }
  0xa5   : > { %v2011_v22 = vld [vmem:[%s2543_s9 + $0x20] sm:$0xff]   ;;  %v2004_v24 = vld [vmem:[#allocation2 + $0x68] sm:$0xff]   ;;  %v1997_v25 = vld [vmem:[#allocation2 + $0x30] sm:$0xff]  }
  0xa6   : > { %v2005_v26 = vld [vmem:[#allocation2 + $0x70] sm:$0xff]   ;;  %v2012_v27 = vld [vmem:[%s2543_s9 + $0x28] sm:$0xff]   ;;  %v1998_v28 = vld [vmem:[#allocation2 + $0x38] sm:$0xff]  }
  0xa7   : > { %1741 = vmatpush3.bf16.msra.mxu0 %v1985_v2  ;;  %1890 = vmatpush3.bf16.msra.mxu1 %v1985_v2  ;;  %v2006_v29 = vld [vmem:[#allocation2 + $0x78] sm:$0xff]   ;;  %v2013_v30 = vld [vmem:[%s2543_s9 + $0x30] sm:$0xff]   ;;  %v2015_v32 = vld [vmem:[%s2546_s20] sm:$0xff]  }
  0xa8   : > { %1742 = vmatprep.subr.bf16.mxu0 %v1986_v3  ;;  %1883 = vmatprep.subr.bf16.mxu1 %v1986_v3  ;;  %v2014_v31 = vld [vmem:[%s2543_s9 + $0x38] sm:$0xff]   ;;  %v2016_v33 = vld [vmem:[%s2546_s20 + $0x8] sm:$0xff]   ;;  %v2017_v34 = vld [vmem:[%s2546_s20 + $0x10] sm:$0xff]   ;;  %s2141_s9 = scalar_lea.vmem %s2744_s21, 4096 }
  0xa9   : > { %v2018_v35 = vld [vmem:[%s2546_s20 + $0x18] sm:$0xff]   ;;  %v2019_v36 = vld [vmem:[%s2546_s20 + $0x20] sm:$0xff]   ;;  %v2020_v37 = vld [vmem:[%s2546_s20 + $0x28] sm:$0xff]   ;;  %p2142_p12 = scmp.ne.s32.totalorder %s2744_s21, %s2141_s9 }
  0xaa   : > { %v2582_v38 = vld [vmem:[%s447_s12] ss:$0 sm:$0xff] }
  0xab   : > { %1743 = vmatpush3.bf16.msra.mxu0 %v1986_v3  ;;  %1891 = vmatpush3.bf16.msra.mxu1 %v1986_v3  ;;  %p2143_p0 = pnand %p2142_p12, %p2853_p13 }
  0xac   : > { %1744 = vmatprep.subr.bf16.mxu0 %v1987_v5  ;;  %1884 = vmatprep.subr.bf16.mxu1 %v1987_v5 }
  0xad   : > { %p2144_p4 = pneg %p2143_p0 }
  0xaf   : > { %1745 = vmatpush3.bf16.msra.mxu0 %v1987_v5  ;;  %1892 = vmatpush3.bf16.msra.mxu1 %v1987_v5 }
  0xb0   : > { %1746 = vmatprep.subr.bf16.mxu0 %v1988_v6  ;;  %1885 = vmatprep.subr.bf16.mxu1 %v1988_v6 }
  0xb3   : > { %1747 = vmatpush3.bf16.msra.mxu0 %v1988_v6  ;;  %1893 = vmatpush3.bf16.msra.mxu1 %v1988_v6 }
  0xb4   : > { %1748 = vmatprep.subr.bf16.mxu0 %v1989_v8  ;;  %1886 = vmatprep.subr.bf16.mxu1 %v1989_v8 }
  0xb7   : > { %1749 = vmatpush3.bf16.msra.mxu0 %v1989_v8  ;;  %1894 = vmatpush3.bf16.msra.mxu1 %v1989_v8 }
  0xb8   : > { %1750 = vmatprep.subr.bf16.mxu0 %v1990_v9  ;;  %1887 = vmatprep.subr.bf16.mxu1 %v1990_v9 }
  0xbb   : > { %1751 = vmatpush3.bf16.msra.mxu0 %v1990_v9  ;;  %1895 = vmatpush3.bf16.msra.mxu1 %v1990_v9 }
  0xbc   : > { %1784 = vmatprep.subr.bf16.mxu1 %v2007_v12  ;;  %1832 = vmatprep.subr.bf16.mxu0 %v2015_v32 }
  0xbe   : > { %1753 = vmatmul.mubr.bf16.vlgmr.msra.gmra.mrb[0].mxu0 %v1992_v10  ;;  %1769 = vmatmul.mubr.bf16.vlgmr.msra.gmra.mrb[0].mxu1 %v2000_v11 }
  0xbf   : > { %1756 = vmatprep.mubr.bf16.mxu0 %v1993_v13  ;;  %1772 = vmatprep.mubr.bf16.mxu1 %v2001_v14 }
  0xc0   : > { %1785 = vmatpush3.bf16.msra.mxu1 %v2007_v12  ;;  %1833 = vmatpush3.bf16.msra.mxu0 %v2015_v32 }
  0xc1   : > { %1786 = vmatprep.subr.bf16.mxu1 %v2008_v15  ;;  %1834 = vmatprep.subr.bf16.mxu0 %v2016_v33 }
  0xc4   : > { %1787 = vmatpush3.bf16.msra.mxu1 %v2008_v15  ;;  %1835 = vmatpush3.bf16.msra.mxu0 %v2016_v33 }
  0xc5   : > { %1788 = vmatprep.subr.bf16.mxu1 %v2009_v16  ;;  %1836 = vmatprep.subr.bf16.mxu0 %v2017_v34 }
  0xc6   : > { %1757 = vmatmul.mubr.bf16.gmra.mrb[4].mxu0 %v1994_v17  ;;  %1773 = vmatmul.mubr.bf16.gmra.mrb[4].mxu1 %v2002_v18 }
  0xc7   : > { %1760 = vmatprep.mubr.bf16.mxu0 %v1995_v19  ;;  %1776 = vmatprep.mubr.bf16.mxu1 %v2003_v20 }
  0xc8   : > { %1789 = vmatpush3.bf16.msra.mxu1 %v2009_v16  ;;  %1837 = vmatpush3.bf16.msra.mxu0 %v2017_v34 }
  0xc9   : > { %1790 = vmatprep.subr.bf16.mxu1 %v2010_v21  ;;  %1838 = vmatprep.subr.bf16.mxu0 %v2018_v35 }
  0xcc   : > { %1791 = vmatpush3.bf16.msra.mxu1 %v2010_v21  ;;  %1839 = vmatpush3.bf16.msra.mxu0 %v2018_v35 }
  0xcd   : > { %1792 = vmatprep.subr.bf16.mxu1 %v2011_v22  ;;  %1840 = vmatprep.subr.bf16.mxu0 %v2019_v36 }
  0xce   : > { %1761 = vmatmul.mubr.bf16.gmra.mrb[8].mxu0 %v1996_v23  ;;  %1777 = vmatmul.mubr.bf16.gmra.mrb[8].mxu1 %v2004_v24 }
  0xcf   : > { %1764 = vmatprep.mubr.bf16.mxu0 %v1997_v25  ;;  %1780 = vmatprep.mubr.bf16.mxu1 %v2005_v26 }
  0xd0   : > { %1793 = vmatpush3.bf16.msra.mxu1 %v2011_v22  ;;  %1841 = vmatpush3.bf16.msra.mxu0 %v2019_v36 }
  0xd1   : > { %1794 = vmatprep.subr.bf16.mxu1 %v2012_v27  ;;  %1842 = vmatprep.subr.bf16.mxu0 %v2020_v37 }
  0xd4   : > { %1795 = vmatpush3.bf16.msra.mxu1 %v2012_v27  ;;  %1843 = vmatpush3.bf16.msra.mxu0 %v2020_v37 }
  0xd5   : > { %1796 = vmatprep.subr.bf16.mxu1 %v2013_v30 }
  0xd6   : > { %1765 = vmatmul.mubr.bf16.gmra.mrb[12].mxu0 %v1998_v28  ;;  %1781 = vmatmul.mubr.bf16.gmra.mrb[12].mxu1 %v2006_v29 }
  0xd8   : > { %1797 = vmatpush3.bf16.msra.mxu1 %v2013_v30 }
  0xd9   : > { %1798 = vmatprep.subr.bf16.mxu1 %v2014_v31 }
  0xdc   : > { %1799 = vmatpush3.bf16.msra.mxu1 %v2014_v31 }
 0x191   : > { %v1754_v39 = vpop.f32.mrb[0].mxu0  ;;  %v1770_v40 = vpop.f32.mrb[0].mxu1 }
 0x192   : > { %v698_v41 = vadd.f32 %v1754_v39, %v2582_v38  ;;  %v689_v42 = vpop.f32.mrb[1].mxu0  ;;  %v762_v43 = vadd.f32 %v1770_v40, %v2582_v38  ;;  %v753_v44 = vpop.f32.mrb[1].mxu1 }
 0x193   : > { %v690_v45 = vadd.f32 %v2582_v38, %v689_v42  ;;  %v1755_v46 = vpop.f32.mrb[2].mxu0  ;;  %v754_v47 = vadd.f32 %v2582_v38, %v753_v44  ;;  %v1771_v48 = vpop.f32.mrb[2].mxu1 }
 0x194   : > { %v701_v49 = vadd.f32 %v1755_v46, %v2582_v38  ;;  %v692_v50 = vpop.f32.mrb[3].mxu0  ;;  %v834_v51 = vmax.f32 %v762_v43, 0.0  ;;  %v765_v52 = vadd.f32 %v1771_v48, %v2582_v38  ;;  %v756_v53 = vpop.f32.mrb[3].mxu1  ;;  %v818_v57 = vmax.f32 %v698_v41, 0.0 }
 0x195   : > { %v693_v54 = vadd.f32 %v2582_v38, %v692_v50  ;;  %v832_v55 = vmax.f32 %v754_v47, 0.0  ;;  %v757_v56 = vadd.f32 %v2582_v38, %v756_v53  ;;  %v816_v60 = vmax.f32 %v690_v45, 0.0 }
 0x196   : > { %v819_v58 = vmax.f32 %v701_v49, 0.0  ;;  %v835_v59 = vmax.f32 %v765_v52, 0.0 }
 0x197   : > { %v817_v61 = vmax.f32 %v693_v54, 0.0  ;;  %v833_v62 = vmax.f32 %v757_v56, 0.0 }
 0x198   : > { %v849_v63 = vpack.c.bf16 %v819_v58, %v818_v57  ;;  %v2592_v0 = vpack.c.bf16 %v835_v59, %v834_v51 }
 0x199   : > { %v848_v1 = vpack.c.bf16 %v817_v61, %v816_v60  ;;  %v1758_v2 = vpop.f32.mrb[4].mxu0  ;;  %v2594_v3 = vpack.c.bf16 %v833_v62, %v832_v55  ;;  %v1774_v4 = vpop.f32.mrb[4].mxu1 }
 0x19a   : > { %v714_v5 = vadd.f32 %v1758_v2, %v2582_v38  ;;  %v705_v6 = vpop.f32.mrb[5].mxu0  ;;  %v778_v7 = vadd.f32 %v1774_v4, %v2582_v38  ;;  %v769_v8 = vpop.f32.mrb[5].mxu1 }
 0x19b   : > { %v706_v9 = vadd.f32 %v2582_v38, %v705_v6  ;;  %v1759_v10 = vpop.f32.mrb[6].mxu0  ;;  %1800 = vmatprep.mubr.bf16.mxu1 %v848_v1  ;;  %v770_v11 = vadd.f32 %v2582_v38, %v769_v8  ;;  %v1775_v12 = vpop.f32.mrb[6].mxu1 }
 0x19c   : > { %v717_v13 = vadd.f32 %v1759_v10, %v2582_v38  ;;  %v708_v14 = vpop.f32.mrb[7].mxu0  ;;  %1801 = vmatmul.mubr.bf16.vlgmr.msra.gmra.mrb[16].mxu1 %v849_v63  ;;  %v838_v15 = vmax.f32 %v778_v7, 0.0  ;;  %v781_v16 = vadd.f32 %v1775_v12, %v2582_v38  ;;  %v772_v17 = vpop.f32.mrb[7].mxu1  ;;  %v822_v21 = vmax.f32 %v714_v5, 0.0 }
 0x19d   : > { %v709_v18 = vadd.f32 %v2582_v38, %v708_v14  ;;  %v836_v19 = vmax.f32 %v770_v11, 0.0  ;;  %v773_v20 = vadd.f32 %v2582_v38, %v772_v17  ;;  %v820_v24 = vmax.f32 %v706_v9, 0.0 }
 0x19e   : > { %v823_v22 = vmax.f32 %v717_v13, 0.0  ;;  %v839_v23 = vmax.f32 %v781_v16, 0.0 }
 0x19f   : > { %v821_v25 = vmax.f32 %v709_v18, 0.0  ;;  %v837_v26 = vmax.f32 %v773_v20, 0.0 }
 0x1a0   : > { %v851_v27 = vpack.c.bf16 %v823_v22, %v822_v21  ;;  %v2604_v28 = vpack.c.bf16 %v839_v23, %v838_v15 }
 0x1a1   : > { %v850_v29 = vpack.c.bf16 %v821_v25, %v820_v24  ;;  %v1762_v30 = vpop.f32.mrb[8].mxu0  ;;  %v2606_v31 = vpack.c.bf16 %v837_v26, %v836_v19  ;;  %v1778_v32 = vpop.f32.mrb[8].mxu1  ;;  %v2022_v26 = vld [vmem:[%s2546_s20 + $0x38] sm:$0xff]  }
 0x1a2   : > { %v730_v33 = vadd.f32 %v1762_v30, %v2582_v38  ;;  %v721_v34 = vpop.f32.mrb[9].mxu0  ;;  %v794_v35 = vadd.f32 %v1778_v32, %v2582_v38  ;;  %v785_v36 = vpop.f32.mrb[9].mxu1 }
 0x1a3   : > { %v722_v37 = vadd.f32 %v2582_v38, %v721_v34  ;;  %v1763_v39 = vpop.f32.mrb[10].mxu0  ;;  %1804 = vmatprep.mubr.bf16.mxu1 %v850_v29  ;;  %v786_v40 = vadd.f32 %v2582_v38, %v785_v36  ;;  %v1779_v41 = vpop.f32.mrb[10].mxu1 }
 0x1a4   : > { %v733_v42 = vadd.f32 %v1763_v39, %v2582_v38  ;;  %v724_v43 = vpop.f32.mrb[11].mxu0  ;;  %1805 = vmatmul.mubr.bf16.gmra.mrb[20].mxu1 %v851_v27  ;;  %v842_v44 = vmax.f32 %v794_v35, 0.0  ;;  %v797_v45 = vadd.f32 %v1779_v41, %v2582_v38  ;;  %v788_v46 = vpop.f32.mrb[11].mxu1  ;;  %v826_v50 = vmax.f32 %v730_v33, 0.0 }
 0x1a5   : > { %v725_v47 = vadd.f32 %v2582_v38, %v724_v43  ;;  %v840_v48 = vmax.f32 %v786_v40, 0.0  ;;  %v789_v49 = vadd.f32 %v2582_v38, %v788_v46  ;;  %v824_v53 = vmax.f32 %v722_v37, 0.0 }
 0x1a6   : > { %v827_v51 = vmax.f32 %v733_v42, 0.0  ;;  %v843_v52 = vmax.f32 %v797_v45, 0.0 }
 0x1a7   : > { %v825_v54 = vmax.f32 %v725_v47, 0.0  ;;  %v841_v55 = vmax.f32 %v789_v49, 0.0 }
 0x1a8   : > { %v853_v56 = vpack.c.bf16 %v827_v51, %v826_v50  ;;  %v861_v57 = vpack.c.bf16 %v843_v52, %v842_v44 }
 0x1a9   : > { %v852_v58 = vpack.c.bf16 %v825_v54, %v824_v53  ;;  %v1766_v59 = vpop.f32.mrb[12].mxu0  ;;  %v860_v60 = vpack.c.bf16 %v841_v55, %v840_v48  ;;  %v1782_v61 = vpop.f32.mrb[12].mxu1 }
 0x1aa   : > { %v746_v62 = vadd.f32 %v1766_v59, %v2582_v38  ;;  %v737_v63 = vpop.f32.mrb[13].mxu0  ;;  %v810_v1 = vadd.f32 %v1782_v61, %v2582_v38  ;;  %v801_v2 = vpop.f32.mrb[13].mxu1 }
 0x1ab   : > { %v738_v4 = vadd.f32 %v2582_v38, %v737_v63  ;;  %v1767_v5 = vpop.f32.mrb[14].mxu0  ;;  %1808 = vmatprep.mubr.bf16.mxu1 %v852_v58  ;;  %v802_v6 = vadd.f32 %v2582_v38, %v801_v2  ;;  %v1783_v7 = vpop.f32.mrb[14].mxu1 }
 0x1ac   : > { %v749_v8 = vadd.f32 %v1767_v5, %v2582_v38  ;;  %v740_v9 = vpop.f32.mrb[15].mxu0  ;;  %1809 = vmatmul.mubr.bf16.gmra.mrb[24].mxu1 %v853_v56  ;;  %v846_v10 = vmax.f32 %v810_v1, 0.0  ;;  %v813_v11 = vadd.f32 %v1783_v7, %v2582_v38  ;;  %v804_v12 = vpop.f32.mrb[15].mxu1  ;;  %v830_v16 = vmax.f32 %v746_v62, 0.0 }
 0x1ad   : > { %v741_v13 = vadd.f32 %v2582_v38, %v740_v9  ;;  %v844_v14 = vmax.f32 %v802_v6, 0.0  ;;  %v805_v15 = vadd.f32 %v2582_v38, %v804_v12  ;;  %v828_v19 = vmax.f32 %v738_v4, 0.0  ;;  %v2021_v38 = vld [vmem:[%s2546_s20 + $0x30] sm:$0xff]   ;;  %s2145_s20 = sshll.u32 %s2239_s13, 4  ;;  %s2146_s20 = int_to_ptr.vmem [resolvable:$false] %s2145_s20 }
 0x1ae   : > { %v831_v17 = vmax.f32 %v749_v8, 0.0  ;;  %v847_v18 = vmax.f32 %v813_v11, 0.0  ;;  %1844 = vmatprep.subr.bf16.mxu0 %v2021_v38  ;;  %s2147_s19 = scalar_lea.vmem %s2146_s20, 8192  ;;  %p2148_p9 = scmp.lt.s32.totalorder %s2744_s21, %s2146_s20 }
 0x1af   : > { %v829_v20 = vmax.f32 %v741_v13, 0.0  ;;  %v845_v21 = vmax.f32 %v805_v15, 0.0  ;;  %1845 = vmatpush3.bf16.msra.mxu0 %v2021_v38  ;;  %p2149_p6 = scmp.lt.s32.totalorder %s2147_s19, %s2141_s9 }
 0x1b0   : > { %v855_v22 = vpack.c.bf16 %v831_v17, %v830_v16  ;;  %v863_v23 = vpack.c.bf16 %v847_v18, %v846_v10  ;;  %1846 = vmatprep.subr.bf16.mxu0 %v2022_v26 }
 0x1b1   : > { %v854_v24 = vpack.c.bf16 %v829_v20, %v828_v19  ;;  %v862_v25 = vpack.c.bf16 %v845_v21, %v844_v14  ;;  %p2150_p10 = por %p2149_p6, %p2148_p9 }
 0x1b3   : > { %1812 = vmatprep.mubr.bf16.mxu1 %v854_v24  ;;  %1847 = vmatpush3.bf16.msra.mxu0 %v2022_v26  ;;  %p2151_p5 = pnand %p2150_p10, %p2144_p4 }
 0x1b4   : > { %1813 = vmatmul.mubr.bf16.gmra.mrb[28].mxu1 %v855_v22 }
 0x1b5   : > { %1816 = vmatprep.mubr.bf16.mxu1 %v2594_v3  ;;  %v2634_v3 = vld [vmem:[%s450_s15] ss:$0 sm:$0xff] }
 0x1bc   : > { %1817 = vmatmul.mubr.bf16.gmra.mrb[32].mxu1 %v2592_v0 }
 0x1bd   : > { %1820 = vmatprep.mubr.bf16.mxu1 %v2606_v31 }
 0x1c4   : > { %1821 = vmatmul.mubr.bf16.gmra.mrb[36].mxu1 %v2604_v28 }
 0x1c5   : > { %1824 = vmatprep.mubr.bf16.mxu1 %v860_v60 }
 0x1cc   : > { %1825 = vmatmul.mubr.bf16.gmra.mrb[40].mxu1 %v861_v57 }
 0x1cd   : > { %1828 = vmatprep.mubr.bf16.mxu1 %v862_v25 }
 0x1d4   : > { %1829 = vmatmul.mubr.bf16.gmra.mrb[44].mxu1 %v863_v23 }
 0x26f   : > { %v1802_v0 = vpop.f32.mrb[16].mxu1 }
 0x270   : > { %v978_v27 = vadd.f32 %v1802_v0, %v2634_v3  ;;  %v969_v28 = vpop.f32.mrb[17].mxu1 }
 0x271   : > { %v970_v29 = vadd.f32 %v2634_v3, %v969_v28  ;;  %v1803_v30 = vpop.f32.mrb[18].mxu1 }
 0x272   : > { %v981_v31 = vadd.f32 %v1803_v30, %v2634_v3  ;;  %v972_v32 = vpop.f32.mrb[19].mxu1  ;;  %v1098_v34 = vmax.f32 %v978_v27, 0.0 }
 0x273   : > { %v973_v33 = vadd.f32 %v2634_v3, %v972_v32  ;;  %v1096_v36 = vmax.f32 %v970_v29, 0.0 }
 0x274   : > { %v1099_v35 = vmax.f32 %v981_v31, 0.0 }
 0x275   : > { %v1097_v37 = vmax.f32 %v973_v33, 0.0 }
 0x276   : > { %v1129_v39 = vpack.c.bf16 %v1099_v35, %v1098_v34 }
 0x277   : > { %v1128_v40 = vpack.c.bf16 %v1097_v37, %v1096_v36  ;;  %v1806_v41 = vpop.f32.mrb[20].mxu1 }
 0x278   : > { %v994_v42 = vadd.f32 %v1806_v41, %v2634_v3  ;;  %v985_v43 = vpop.f32.mrb[21].mxu1 }
 0x279   : > { %v986_v44 = vadd.f32 %v2634_v3, %v985_v43  ;;  %v1807_v45 = vpop.f32.mrb[22].mxu1  ;;  %1848 = vmatprep.mubr.bf16.mxu0 %v1128_v40 }
 0x27a   : > { %v997_v46 = vadd.f32 %v1807_v45, %v2634_v3  ;;  %v988_v47 = vpop.f32.mrb[23].mxu1  ;;  %1849 = vmatmul.mubr.bf16.vlgmr.msra.gmra.mrb[16].mxu0 %v1129_v39  ;;  %v1102_v49 = vmax.f32 %v994_v42, 0.0 }
 0x27b   : > { %v989_v48 = vadd.f32 %v2634_v3, %v988_v47  ;;  %v1100_v51 = vmax.f32 %v986_v44, 0.0 }
 0x27c   : > { %v1103_v50 = vmax.f32 %v997_v46, 0.0 }
 0x27d   : > { %v1101_v52 = vmax.f32 %v989_v48, 0.0 }
 0x27e   : > { %v1131_v53 = vpack.c.bf16 %v1103_v50, %v1102_v49 }
 0x27f   : > { %v1130_v54 = vpack.c.bf16 %v1101_v52, %v1100_v51  ;;  %v1810_v55 = vpop.f32.mrb[24].mxu1 }
 0x280   : > { %v1010_v56 = vadd.f32 %v1810_v55, %v2634_v3  ;;  %v1001_v57 = vpop.f32.mrb[25].mxu1 }
 0x281   : > { %v1002_v58 = vadd.f32 %v2634_v3, %v1001_v57  ;;  %v1811_v59 = vpop.f32.mrb[26].mxu1  ;;  %1852 = vmatprep.mubr.bf16.mxu0 %v1130_v54 }
 0x282   : > { %v1013_v60 = vadd.f32 %v1811_v59, %v2634_v3  ;;  %v1004_v61 = vpop.f32.mrb[27].mxu1  ;;  %1853 = vmatmul.mubr.bf16.gmra.mrb[20].mxu0 %v1131_v53  ;;  %v1106_v63 = vmax.f32 %v1010_v56, 0.0 }
 0x283   : > { %v1005_v62 = vadd.f32 %v2634_v3, %v1004_v61  ;;  %v1104_v2 = vmax.f32 %v1002_v58, 0.0 }
 0x284   : > { %v1107_v1 = vmax.f32 %v1013_v60, 0.0 }
 0x285   : > { %v1105_v4 = vmax.f32 %v1005_v62, 0.0 }
 0x286   : > { %v1133_v5 = vpack.c.bf16 %v1107_v1, %v1106_v63 }
 0x287   : > { %v1132_v6 = vpack.c.bf16 %v1105_v4, %v1104_v2  ;;  %v1814_v7 = vpop.f32.mrb[28].mxu1 }
 0x288   : > { %v1026_v8 = vadd.f32 %v1814_v7, %v2634_v3  ;;  %v1017_v9 = vpop.f32.mrb[29].mxu1 }
 0x289   : > { %v1018_v10 = vadd.f32 %v2634_v3, %v1017_v9  ;;  %v1815_v11 = vpop.f32.mrb[30].mxu1  ;;  %1856 = vmatprep.mubr.bf16.mxu0 %v1132_v6 }
 0x28a   : > { %v1029_v12 = vadd.f32 %v1815_v11, %v2634_v3  ;;  %v1020_v13 = vpop.f32.mrb[31].mxu1  ;;  %1857 = vmatmul.mubr.bf16.gmra.mrb[24].mxu0 %v1133_v5  ;;  %v1110_v15 = vmax.f32 %v1026_v8, 0.0 }
 0x28b   : > { %v1021_v14 = vadd.f32 %v2634_v3, %v1020_v13  ;;  %v1108_v17 = vmax.f32 %v1018_v10, 0.0 }
 0x28c   : > { %v1111_v16 = vmax.f32 %v1029_v12, 0.0 }
 0x28d   : > { %v1109_v18 = vmax.f32 %v1021_v14, 0.0  ;;  %v2673_v14 = vld [vmem:[%s453_s14] ss:$0 sm:$0xff] }
 0x28e   : > { %v1135_v19 = vpack.c.bf16 %v1111_v16, %v1110_v15 }
 0x28f   : > { %v1134_v20 = vpack.c.bf16 %v1109_v18, %v1108_v17  ;;  %v1818_v21 = vpop.f32.mrb[32].mxu1 }
 0x290   : > { %v1042_v22 = vadd.f32 %v1818_v21, %v2634_v3  ;;  %v1033_v23 = vpop.f32.mrb[33].mxu1 }
 0x291   : > { %v1034_v24 = vadd.f32 %v2634_v3, %v1033_v23  ;;  %v1819_v25 = vpop.f32.mrb[34].mxu1  ;;  %1860 = vmatprep.mubr.bf16.mxu0 %v1134_v20 }
 0x292   : > { %v1045_v38 = vadd.f32 %v1819_v25, %v2634_v3  ;;  %v1036_v26 = vpop.f32.mrb[35].mxu1  ;;  %1861 = vmatmul.mubr.bf16.gmra.mrb[28].mxu0 %v1135_v19  ;;  %v1114_v27 = vmax.f32 %v1042_v22, 0.0 }
 0x293   : > { %v1037_v0 = vadd.f32 %v2634_v3, %v1036_v26  ;;  %v1112_v29 = vmax.f32 %v1034_v24, 0.0 }
 0x294   : > { %v1115_v28 = vmax.f32 %v1045_v38, 0.0 }
 0x295   : > { %v1113_v30 = vmax.f32 %v1037_v0, 0.0 }
 0x296   : > { %v1137_v31 = vpack.c.bf16 %v1115_v28, %v1114_v27 }
 0x297   : > { %v1136_v32 = vpack.c.bf16 %v1113_v30, %v1112_v29  ;;  %v1822_v33 = vpop.f32.mrb[36].mxu1 }
 0x298   : > { %v1058_v34 = vadd.f32 %v1822_v33, %v2634_v3  ;;  %v1049_v35 = vpop.f32.mrb[37].mxu1 }
 0x299   : > { %v1050_v36 = vadd.f32 %v2634_v3, %v1049_v35  ;;  %v1823_v37 = vpop.f32.mrb[38].mxu1  ;;  %1864 = vmatprep.mubr.bf16.mxu0 %v1136_v32 }
 0x29a   : > { %v1061_v39 = vadd.f32 %v1823_v37, %v2634_v3  ;;  %v1052_v40 = vpop.f32.mrb[39].mxu1  ;;  %1865 = vmatmul.mubr.bf16.gmra.mrb[32].mxu0 %v1137_v31  ;;  %v1118_v42 = vmax.f32 %v1058_v34, 0.0 }
 0x29b   : > { %v1053_v41 = vadd.f32 %v2634_v3, %v1052_v40  ;;  %v1116_v44 = vmax.f32 %v1050_v36, 0.0 }
 0x29c   : > { %v1119_v43 = vmax.f32 %v1061_v39, 0.0 }
 0x29d   : > { %v1117_v45 = vmax.f32 %v1053_v41, 0.0 }
 0x29e   : > { %v1139_v46 = vpack.c.bf16 %v1119_v43, %v1118_v42 }
 0x29f   : > { %v1138_v47 = vpack.c.bf16 %v1117_v45, %v1116_v44  ;;  %v1826_v48 = vpop.f32.mrb[40].mxu1 }
 0x2a0   : > { %v1074_v49 = vadd.f32 %v1826_v48, %v2634_v3  ;;  %v1065_v50 = vpop.f32.mrb[41].mxu1 }
 0x2a1   : > { %v1066_v51 = vadd.f32 %v2634_v3, %v1065_v50  ;;  %v1827_v52 = vpop.f32.mrb[42].mxu1  ;;  %1868 = vmatprep.mubr.bf16.mxu0 %v1138_v47 }
 0x2a2   : > { %v1077_v53 = vadd.f32 %v1827_v52, %v2634_v3  ;;  %v1068_v54 = vpop.f32.mrb[43].mxu1  ;;  %1869 = vmatmul.mubr.bf16.gmra.mrb[36].mxu0 %v1139_v46  ;;  %v1122_v56 = vmax.f32 %v1074_v49, 0.0 }
 0x2a3   : > { %v1069_v55 = vadd.f32 %v2634_v3, %v1068_v54  ;;  %v1120_v58 = vmax.f32 %v1066_v51, 0.0 }
 0x2a4   : > { %v1123_v57 = vmax.f32 %v1077_v53, 0.0 }
 0x2a5   : > { %v1121_v59 = vmax.f32 %v1069_v55, 0.0 }
 0x2a6   : > { %v1141_v60 = vpack.c.bf16 %v1123_v57, %v1122_v56 }
 0x2a7   : > { %v1140_v61 = vpack.c.bf16 %v1121_v59, %v1120_v58  ;;  %v1830_v62 = vpop.f32.mrb[44].mxu1 }
 0x2a8   : > { %v1090_v63 = vadd.f32 %v1830_v62, %v2634_v3  ;;  %v1081_v1 = vpop.f32.mrb[45].mxu1 }
 0x2a9   : > { %v1082_v2 = vadd.f32 %v2634_v3, %v1081_v1  ;;  %v1831_v4 = vpop.f32.mrb[46].mxu1  ;;  %1872 = vmatprep.mubr.bf16.mxu0 %v1140_v61 }
 0x2aa   : > { %v1093_v5 = vadd.f32 %v1831_v4, %v2634_v3  ;;  %v1084_v6 = vpop.f32.mrb[47].mxu1  ;;  %1873 = vmatmul.mubr.bf16.gmra.mrb[40].mxu0 %v1141_v60  ;;  %v1126_v8 = vmax.f32 %v1090_v63, 0.0 }
 0x2ab   : > { %v1085_v7 = vadd.f32 %v2634_v3, %v1084_v6  ;;  %v1124_v10 = vmax.f32 %v1082_v2, 0.0 }
 0x2ac   : > { %v1127_v9 = vmax.f32 %v1093_v5, 0.0 }
 0x2ad   : > { %v1125_v11 = vmax.f32 %v1085_v7, 0.0 }
 0x2ae   : > { %v1143_v12 = vpack.c.bf16 %v1127_v9, %v1126_v8 }
 0x2af   : > { %v1142_v13 = vpack.c.bf16 %v1125_v11, %v1124_v10 }
 0x2b1   : > { %1876 = vmatprep.mubr.bf16.mxu0 %v1142_v13 }
 0x2b2   : > { %1877 = vmatmul.mubr.bf16.gmra.mrb[44].mxu0 %v1143_v12 }
 0x34d   : > { %v1850_v15 = vpop.f32.mrb[16].mxu0 }
 0x34e   : > { %v1258_v16 = vadd.f32 %v1850_v15, %v2673_v14  ;;  %v1249_v17 = vpop.f32.mrb[17].mxu0 }
 0x34f   : > { %v1250_v3 = vadd.f32 %v2673_v14, %v1249_v17  ;;  %v1851_v18 = vpop.f32.mrb[18].mxu0 }
 0x350   : > { %1378 = vst [vmem:[%s2677_s16 + $0x10] sm:$0xff] %v1258_v16  ;;  %v1261_v19 = vadd.f32 %v1851_v18, %v2673_v14  ;;  %v1252_v20 = vpop.f32.mrb[19].mxu0 }
 0x351   : > { %1376 = vst [vmem:[%s2677_s16] sm:$0xff] %v1250_v3  ;;  %v1253_v21 = vadd.f32 %v2673_v14, %v1252_v20 }
 0x352   : > { %1379 = vst [vmem:[%s2677_s16 + $0x18] sm:$0xff] %v1261_v19 }
 0x353   : > { %1377 = vst [vmem:[%s2677_s16 + $0x8] sm:$0xff] %v1253_v21 }
 0x355   : > { %v1854_v22 = vpop.f32.mrb[20].mxu0 }
 0x356   : > { %v1274_v23 = vadd.f32 %v1854_v22, %v2673_v14  ;;  %v1265_v24 = vpop.f32.mrb[21].mxu0 }
 0x357   : > { %v1266_v25 = vadd.f32 %v2673_v14, %v1265_v24  ;;  %v1855_v38 = vpop.f32.mrb[22].mxu0 }
 0x358   : > { %1382 = vst [vmem:[%s2677_s16 + $0x30] sm:$0xff] %v1274_v23  ;;  %v1277_v26 = vadd.f32 %v1855_v38, %v2673_v14  ;;  %v1268_v0 = vpop.f32.mrb[23].mxu0 }
 0x359   : > { %1380 = vst [vmem:[%s2677_s16 + $0x20] sm:$0xff] %v1266_v25  ;;  %v1269_v27 = vadd.f32 %v2673_v14, %v1268_v0 }
 0x35a   : > { %1383 = vst [vmem:[%s2677_s16 + $0x38] sm:$0xff] %v1277_v26 }
 0x35b   : > { %1381 = vst [vmem:[%s2677_s16 + $0x28] sm:$0xff] %v1269_v27 }
 0x35d   : > { %v1858_v28 = vpop.f32.mrb[24].mxu0 }
 0x35e   : > { %v1290_v29 = vadd.f32 %v1858_v28, %v2673_v14  ;;  %v1281_v30 = vpop.f32.mrb[25].mxu0 }
 0x35f   : > { %v1282_v31 = vadd.f32 %v2673_v14, %v1281_v30  ;;  %v1859_v32 = vpop.f32.mrb[26].mxu0 }
 0x360   : > { %1386 = vst [vmem:[%s2677_s16 + $0x50] sm:$0xff] %v1290_v29  ;;  %v1293_v33 = vadd.f32 %v1859_v32, %v2673_v14  ;;  %v1284_v34 = vpop.f32.mrb[27].mxu0 }
 0x361   : > { %1384 = vst [vmem:[%s2677_s16 + $0x40] sm:$0xff] %v1282_v31  ;;  %v1285_v35 = vadd.f32 %v2673_v14, %v1284_v34 }
 0x362   : > { %1387 = vst [vmem:[%s2677_s16 + $0x58] sm:$0xff] %v1293_v33 }
 0x363   : > { %1385 = vst [vmem:[%s2677_s16 + $0x48] sm:$0xff] %v1285_v35 }
 0x365   : > { %v1862_v36 = vpop.f32.mrb[28].mxu0 }
 0x366   : > { %v1306_v37 = vadd.f32 %v1862_v36, %v2673_v14  ;;  %v1297_v39 = vpop.f32.mrb[29].mxu0 }
 0x367   : > { %v1298_v40 = vadd.f32 %v2673_v14, %v1297_v39  ;;  %v1863_v41 = vpop.f32.mrb[30].mxu0 }
 0x368   : > { %1390 = vst [vmem:[%s2677_s16 + $0x70] sm:$0xff] %v1306_v37  ;;  %v1309_v42 = vadd.f32 %v1863_v41, %v2673_v14  ;;  %v1300_v43 = vpop.f32.mrb[31].mxu0 }
 0x369   : > { %1388 = vst [vmem:[%s2677_s16 + $0x60] sm:$0xff] %v1298_v40  ;;  %v1301_v44 = vadd.f32 %v2673_v14, %v1300_v43 }
 0x36a   : > { %1391 = vst [vmem:[%s2677_s16 + $0x78] sm:$0xff] %v1309_v42 }
 0x36b   : > { %1389 = vst [vmem:[%s2677_s16 + $0x68] sm:$0xff] %v1301_v44 }
 0x36d   : > { %v1866_v45 = vpop.f32.mrb[32].mxu0 }
 0x36e   : > { %v1322_v46 = vadd.f32 %v1866_v45, %v2673_v14  ;;  %v1313_v47 = vpop.f32.mrb[33].mxu0 }
 0x36f   : > { %v1314_v48 = vadd.f32 %v2673_v14, %v1313_v47  ;;  %v1867_v49 = vpop.f32.mrb[34].mxu0 }
 0x370   : > { %1394 = vst [vmem:[%s2677_s16 + $0x90] sm:$0xff] %v1322_v46  ;;  %v1325_v50 = vadd.f32 %v1867_v49, %v2673_v14  ;;  %v1316_v51 = vpop.f32.mrb[35].mxu0 }
 0x371   : > { %1392 = vst [vmem:[%s2677_s16 + $0x80] sm:$0xff] %v1314_v48  ;;  %v1317_v52 = vadd.f32 %v2673_v14, %v1316_v51 }
 0x372   : > { %1395 = vst [vmem:[%s2677_s16 + $0x98] sm:$0xff] %v1325_v50 }
 0x373   : > { %1393 = vst [vmem:[%s2677_s16 + $0x88] sm:$0xff] %v1317_v52 }
 0x375   : > { %v1870_v53 = vpop.f32.mrb[36].mxu0 }
 0x376   : > { %v1338_v54 = vadd.f32 %v1870_v53, %v2673_v14  ;;  %v1329_v55 = vpop.f32.mrb[37].mxu0 }
 0x377   : > { %v1330_v56 = vadd.f32 %v2673_v14, %v1329_v55  ;;  %v1871_v57 = vpop.f32.mrb[38].mxu0 }
 0x378   : > { %1398 = vst [vmem:[%s2677_s16 + $0xb0] sm:$0xff] %v1338_v54  ;;  %v1341_v58 = vadd.f32 %v1871_v57, %v2673_v14  ;;  %v1332_v59 = vpop.f32.mrb[39].mxu0 }
 0x379   : > { %1396 = vst [vmem:[%s2677_s16 + $0xa0] sm:$0xff] %v1330_v56  ;;  %v1333_v60 = vadd.f32 %v2673_v14, %v1332_v59 }
 0x37a   : > { %1399 = vst [vmem:[%s2677_s16 + $0xb8] sm:$0xff] %v1341_v58 }
 0x37b   : > { %1397 = vst [vmem:[%s2677_s16 + $0xa8] sm:$0xff] %v1333_v60 }
 0x37d   : > { %v1874_v61 = vpop.f32.mrb[40].mxu0 }
 0x37e   : > { %v1354_v62 = vadd.f32 %v1874_v61, %v2673_v14  ;;  %v1345_v63 = vpop.f32.mrb[41].mxu0 }
 0x37f   : > { %v1346_v1 = vadd.f32 %v2673_v14, %v1345_v63  ;;  %v1875_v2 = vpop.f32.mrb[42].mxu0 }
 0x380   : > { %1402 = vst [vmem:[%s2677_s16 + $0xd0] sm:$0xff] %v1354_v62  ;;  %v1357_v4 = vadd.f32 %v1875_v2, %v2673_v14  ;;  %v1348_v5 = vpop.f32.mrb[43].mxu0 }
 0x381   : > { %1400 = vst [vmem:[%s2677_s16 + $0xc0] sm:$0xff] %v1346_v1  ;;  %v1349_v6 = vadd.f32 %v2673_v14, %v1348_v5 }
 0x382   : > { %1403 = vst [vmem:[%s2677_s16 + $0xd8] sm:$0xff] %v1357_v4 }
 0x383   : > { %1401 = vst [vmem:[%s2677_s16 + $0xc8] sm:$0xff] %v1349_v6 }
 0x385   : > { %v1878_v7 = vpop.f32.mrb[44].mxu0 }
 0x386   : > { %v1370_v8 = vadd.f32 %v1878_v7, %v2673_v14  ;;  %v1361_v9 = vpop.f32.mrb[45].mxu0 }
 0x387   : > { %v1362_v10 = vadd.f32 %v2673_v14, %v1361_v9  ;;  %v1879_v11 = vpop.f32.mrb[46].mxu0 }
 0x388   : > { %1406 = vst [vmem:[%s2677_s16 + $0xf0] sm:$0xff] %v1370_v8  ;;  %v1373_v12 = vadd.f32 %v1879_v11, %v2673_v14  ;;  %v1364_v13 = vpop.f32.mrb[47].mxu0 }
 0x389   : > { %1404 = vst [vmem:[%s2677_s16 + $0xe0] sm:$0xff] %v1362_v10  ;;  %v1365_v15 = vadd.f32 %v2673_v14, %v1364_v13 }
 0x38a   : > { %1407 = vst [vmem:[%s2677_s16 + $0xf8] sm:$0xff] %v1373_v12 }
 0x38b   : > { %1405 = vst [vmem:[%s2677_s16 + $0xe8] sm:$0xff] %v1365_v15 }
 0x38c   : > { %2154 = shalt.err (!%p2151_p5)
}
 0x38d   : > { %s2155_s10 = scalar_lea.hbm %s2742_s11, 4096  ;;  %s2159_s1 = scalar_lea.hbm %s2803_s7, 16384 }
 0x38e   : > { %p2156_p3 = scmp.ne.s32.totalorder %s2742_s11, %s2155_s10  ;;  %p2160_p11 = scmp.lt.u32.totalorder %s2742_s11, %s2803_s7 }
 0x38f   : > { %p2161_p1 = scmp.lt.u32.totalorder %s2159_s1, %s2155_s10  ;;  %p2163_p12 = scmp.lt.u32.totalorder %s2155_s10, %s2742_s11 }
 0x390   : > { %p2157_p8 = pnand %p2156_p3, %p2853_p13 }
 0x391   : > { %p2162_p2 = por %p2161_p1, %p2160_p11 }
 0x392   : > { %p2158_p7 = pneg %p2157_p8 }
 0x393   : > { %p2164_p0 = por %p2163_p12, %p2162_p2 }
 0x395   : > { %p2165_p4 = pnand %p2164_p0, %p2158_p7 }
 0x397   : > { %2168 = shalt.err (!%p2165_p4)
}
 0x398   : > { %s2240_s3 = smov 128   ;;  %s2241_s29 = smov 8  }
 0x399   : > { %1906 = dma.vmem_to_hbm [thread:$0]  (%p2853_p13), %s2744_s21, 4096, %s2742_s11, %s1409_s27, %s2240_s3, %s2240_s3, %s2241_s29  }
 0x39a PF: > { %s2854_s14 = sld [smem:[#allocation17_spill]]  ;;  %s2855_s22 = sld [smem:[#allocation15_spill]] }
 0x39b   : > { %s2856_s16 = sld [smem:[#allocation20_spill]] }
 0x3a0   : > { %p1929_p9 = scmp.ge.s32.totalorder %s2854_s14, 2  ;;  %s1439_s28 = sand.u32 1, %s2855_s22  }
 0x3a1   : > { %p2857_p6 = scmp.ne.s32.totalorder %s2856_s16, 0  ;;  %s1440_s23 = scalar_lea.sflag [#allocation4], %s1439_s28 }
 0x3a3   : > { %p1923_p10 = pnand %p1929_p9, %p2857_p6 }
 0x3a5   : > { %2206 = dma.done.wait (!%p1923_p10), %s1440_s23, 4096  }
 0x3a6   : > { %2208 = vsyncadd (!%p1923_p10), %s1440_s23, 4294963200  ;;  %s27_s29 = sadd.s32 1, %s2854_s14   ;;  %s2858_s9 = sld [smem:[#allocation19_spill]] }
 0x3a7   : > { %p24_p5 = scmp.ge.s32.totalorder %s27_s29, 6   ;;  %s2859_s27 = sld [smem:[#allocation16_spill]] }
 0x3a8   : > { %s2860_s28 = sld [smem:[#allocation18_spill]]  ;;  %s2861_s24 = smov %s2215_s25 }
 0x3a9   : > { %s2862_s25 = smov %s2219_s26  ;;  %26 = sbr.rel (!%p24_p5) target bundleno = 12 (0xc), region = 132 }
 0x3ac   : > { %s2863_s26 = smov %s2858_s9 }
 0x3b0   :  { %1445 = vsyncpa [#allocation3], 1 }
 0x3b1   :  { %1447 = vsyncpa [#allocation3 + $0x1], 1 }
 0x3b2   :  { %1448 = vsyncpa [#allocation6], 1 }
 0x3b3   :  { %1450 = vsyncpa [#allocation6 + $0x1], 1 }
 0x3b4   :  { %1451 = vsyncpa [#allocation9], 1 }
 0x3b5   :  { %1453 = vsyncpa [#allocation9 + $0x1], 1 }
 0x3b6   :  { %1454 = vsyncpa [#allocation4], 1 }
 0x3b7   :  { %1456 = vsyncpa [#allocation4 + $0x1], 1 }

</bundles_post_ra>
